<compile_context>
chip_gen: v7x
topology: tpu7x:2x2x1
jax: 0.10.0
libtpu: 0.0.40
codegen_flags: <defaults>
</compile_context>

<pallas_src>
import functools

import numpy as np

import jax
import jax.numpy as jnp
from jax.experimental import pallas as pl
from jax.experimental.pallas import tpu as pltpu


def _dice_partials_kernel(pred_ref, tgt_ref, out_ref, *, num_classes, has_pad):
    # pred_ref: (C, tile_s, 128) raw logits (input dtype preserved, bf16 ok)
    # tgt_ref:  (tile_s, 128) integer labels (original narrow dtype)
    # out_ref:  (2C, 128) float32 per-image accumulators:
    #           rows [0, C)  -> per-class union partials  (|P_c| + |T_c|)
    #           rows [C, 2C) -> per-class overlap partials (|P_c & T_c|)
    k = pl.program_id(1)

    @pl.when(k == 0)
    def _init():
        out_ref[...] = jnp.zeros_like(out_ref)

    # Widen labels on the small VMEM tile (keeps HBM traffic at the narrow dtype).
    tgt = tgt_ref[...].astype(jnp.int32)                         # (tile_s, 128)

    # argmax over channels on raw logits (softmax is monotone per pixel).
    # Running element-wise max tree over the leading class dim; strict '>'
    # keeps the first occurrence on ties (matches torch/jnp argmax).
    best = pred_ref[0]                                           # (tile_s, 128)
    best_idx = jnp.zeros(best.shape, dtype=jnp.int32)
    for c in range(1, num_classes):
        xc = pred_ref[c]
        better = xc > best
        best = jnp.where(better, xc, best)
        best_idx = jnp.where(better, jnp.int32(c), best_idx)

    if has_pad:
        # Padded lanes carry the label sentinel `num_classes`; push the predicted
        # class there too so no one-hot ever fires (2 ops, padded path only).
        best_idx = jnp.where(tgt == num_classes, jnp.int32(num_classes), best_idx)

    # Shared across the class loop (saves one compare per class).
    pred_eq_tgt = (best_idx == tgt).astype(jnp.float32)          # (tile_s, 128)

    # TODO(synk): the three per-class reductions could be routed through the
    # idle MXU (ones-column matmul) for a further ~10%; kept on VPU/XLU here.
    for c in range(num_classes):
        p_f = (best_idx == c).astype(jnp.float32)
        t_hit = tgt == c
        t_f = t_hit.astype(jnp.float32)
        # Reduce over the sublane (row) axis only -> (1, 128) lane partials;
        # the final cross-lane reduction happens once, in JAX, outside.
        union_part = jnp.sum(p_f + t_f, axis=0, keepdims=True)
        overlap_part = jnp.sum(jnp.where(t_hit, pred_eq_tgt, 0.0),
                               axis=0, keepdims=True)
        out_ref[c:c + 1, :] += union_part
        out_ref[num_classes + c:num_classes + c + 1, :] += overlap_part


_PASSTHROUGH_LABEL_DTYPES = (np.dtype(np.int8), np.dtype(np.uint8), np.dtype(np.int32))


def dice_loss(pred, target, *, max_tile_rows=1024,
              vmem_budget_bytes=8 * 1024 * 1024):
    """pred: (N, C, H, W) logits; target: (N, H, W) integer class labels."""
    N, C, H, W = pred.shape
    HW = H * W
    LANE = 128

    # Accept narrow label dtypes as-is (no extra HBM pass); cast only exotic ones.
    if np.dtype(target.dtype) not in _PASSTHROUGH_LABEL_DTYPES:
        target = target.astype(jnp.int32)

    # --- tile sizing: rows of 128 pixels per image, C/dtype/VMEM aware -------
    s_raw = pl.cdiv(HW, LANE)
    bytes_per_row = LANE * (C * pred.dtype.itemsize + target.dtype.itemsize)
    # Sublane granule so sub-32-bit inputs (bf16 pred, int8 labels) stay on
    # native tile boundaries when the row axis is tiled.
    granule = max(8, 32 // pred.dtype.itemsize, 32 // target.dtype.itemsize)
    tile_cap = max(granule,
                   (vmem_budget_bytes // (2 * bytes_per_row)) // granule * granule)
    tile_cap = min(tile_cap, max(max_tile_rows, granule))
    if s_raw <= tile_cap:
        tile_s, num_k = s_raw, 1
    else:
        tile_s = tile_cap
        num_k = pl.cdiv(s_raw, tile_s)
    s_pad = tile_s * num_k
    hw_pad = s_pad * LANE
    has_pad = hw_pad != HW

    # --- layout: free reshapes; pad only when the pixel count is ragged ------
    pred_flat = pred.reshape(N, C, HW)                 # keeps dtype (bf16 ok)
    tgt_flat = target.reshape(N, HW)                   # no dtype cast
    if has_pad:
        pred_flat = jnp.pad(pred_flat, ((0, 0), (0, 0), (0, hw_pad - HW)))
        # Sentinel label C on padded pixels: never matches a real class.
        tgt_flat = jnp.pad(tgt_flat, ((0, 0), (0, hw_pad - HW)),
                           constant_values=C)
    pred4 = pred_flat.reshape(N, C, s_pad, LANE)
    tgt3 = tgt_flat.reshape(N, s_pad, LANE)

    kernel = functools.partial(_dice_partials_kernel,
                               num_classes=C, has_pad=has_pad)

    # TODO(synk): for very small images (HW of a few thousand pixels) several
    # images per grid step would amortize the ~0.35us/step overhead.
    parts = pl.pallas_call(
        kernel,
        out_shape=jax.ShapeDtypeStruct((N, 2 * C, LANE), jnp.float32),
        grid=(N, num_k),
        in_specs=[
            pl.BlockSpec((None, C, tile_s, LANE), lambda n, k: (n, 0, k, 0)),
            pl.BlockSpec((None, tile_s, LANE), lambda n, k: (n, k, 0)),
        ],
        out_specs=pl.BlockSpec((None, 2 * C, LANE), lambda n, k: (n, 0, 0)),
        compiler_params=pltpu.CompilerParams(
            dimension_semantics=("parallel", "arbitrary"),
        ),
    )(pred4, tgt3)

    # Tiny finalize in plain JAX: (N, 2C, 128) partials -> scalar loss.
    per_class = jnp.sum(parts, axis=(0, 2))            # (2C,)
    union = per_class[:C]
    overlap = per_class[C:]
    dice = 2.0 * overlap / (union + 1.0)               # smooth = 1
    return 1.0 - jnp.sum(dice) / (N * C)


def _dice_loss_ref(pred, target):
    """Pure-JAX reference mirroring the PyTorch module."""
    N = target.shape[0]
    C = pred.shape[1]
    sm = jax.nn.softmax(pred, axis=1)
    cls = jnp.argmax(sm, axis=1)
    all_dice = 0.0
    for idx in range(C):
        p = (cls == idx).astype(jnp.float32).reshape(-1)
        t = (target == idx).astype(jnp.float32).reshape(-1)
        union = p.sum() + t.sum()
        overlap = (p * t).sum()
        all_dice = all_dice + 2.0 * overlap / (union + 1.0)
    return 1.0 - all_dice / (N * C)


if __name__ == "__main__":
    key = jax.random.PRNGKey(0)
    k1, k2, k3, k4 = jax.random.split(key, 4)

    # Case 1: small 16x16 images, int32 labels, single pixel tile per image.
    N, C, H, W = 2, 4, 16, 16
    pred = jax.random.normal(k1, (N, C, H, W), dtype=jnp.float32)
    target = jax.random.randint(k2, (N, H, W), 0, C, dtype=jnp.int32)
    loss = dice_loss(pred, target)
    jax.block_until_ready(loss)
    ref = _dice_loss_ref(pred, target)
    assert jnp.allclose(loss, ref, atol=1e-5), (loss, ref)

    # Case 2: 80x80 images (6400 px, not a multiple of the tile), int8 labels
    # passed through untouched -- exercises multi-tile accumulation and the
    # padded/sentinel path.
    N2, C2, H2, W2 = 2, 4, 80, 80
    pred2 = jax.random.normal(k3, (N2, C2, H2, W2), dtype=jnp.float32)
    target2 = jax.random.randint(k4, (N2, H2, W2), 0, C2).astype(jnp.int8)
    loss2 = dice_loss(pred2, target2, max_tile_rows=32)
    jax.block_until_ready(loss2)
    ref2 = _dice_loss_ref(pred2, target2)
    assert jnp.allclose(loss2, ref2, atol=1e-5), (loss2, ref2)

    print("KERNEL_OK")
</pallas_src>

<mosaic_0001>
module attributes {stable_mosaic.version = 11 : i64} {
  func.func @_dice_partials_kernel(%arg0: i32, %arg1: i32, %arg2: memref<1x4x2x128xf32, #tpu.memory_space<vmem>>, %arg3: memref<1x2x128xi32, #tpu.memory_space<vmem>>, %arg4: memref<1x8x128xf32, #tpu.memory_space<vmem>>) attributes {dimension_semantics = [#tpu.dimension_semantics<parallel>, #tpu.dimension_semantics<arbitrary>], iteration_bounds = array<i64: 2, 1>, scalar_prefetch = 0 : i64, scratch_operands = 0 : i64, tpu.core_type = #tpu.core_type<tc>, window_params = [{transform_indices = @transform_0, window_bounds = array<i64: 1, 4, 2, 128>}, {transform_indices = @transform_1, window_bounds = array<i64: 1, 2, 128>}, {transform_indices = @transform_2, window_bounds = array<i64: 1, 8, 128>}]} {
    %c0_i32 = arith.constant 0 : i32
    %0 = arith.cmpi eq, %arg1, %c0_i32 : i32
    %1 = arith.extui %0 : i1 to i32
    %c0_i32_0 = arith.constant 0 : i32
    %2 = arith.cmpi ne, %1, %c0_i32_0 : i32
    scf.if %2 {
      %cst_80 = arith.constant 0.000000e+00 : f32
      %136 = vector.broadcast %cst_80 : f32 to vector<8x128xf32>
      %c0_81 = arith.constant 0 : index
      %c0_82 = arith.constant 0 : index
      %c0_83 = arith.constant 0 : index
      %137 = vector.load %arg4[%c0_81, %c0_82, %c0_83] : memref<1x8x128xf32, #tpu.memory_space<vmem>>, vector<1x8x128xf32>
      %138 = vector.shape_cast %137 : vector<1x8x128xf32> to vector<8x128xf32>
      %139 = vector.shape_cast %136 : vector<8x128xf32> to vector<1x8x128xf32>
      tpu.vector_store %arg4[%c0_81, %c0_82, %c0_83], %139 {strides = array<i32>} : memref<1x8x128xf32, #tpu.memory_space<vmem>>, vector<1x8x128xf32>,
    } else {
    }
    %c0 = arith.constant 0 : index
    %c0_1 = arith.constant 0 : index
    %c0_2 = arith.constant 0 : index
    %3 = vector.load %arg3[%c0, %c0_1, %c0_2] : memref<1x2x128xi32, #tpu.memory_space<vmem>>, vector<1x2x128xi32>
    %4 = vector.shape_cast %3 : vector<1x2x128xi32> to vector<2x128xi32>
    %c0_3 = arith.constant 0 : index
    %c0_4 = arith.constant 0 : index
    %c0_5 = arith.constant 0 : index
    %c0_6 = arith.constant 0 : index
    %5 = vector.load %arg2[%c0_3, %c0_4, %c0_5, %c0_6] : memref<1x4x2x128xf32, #tpu.memory_space<vmem>>, vector<1x1x2x128xf32>
    %6 = vector.shape_cast %5 : vector<1x1x2x128xf32> to vector<2x128xf32>
    %c0_i32_7 = arith.constant 0 : i32
    %7 = vector.broadcast %c0_i32_7 : i32 to vector<2x128xi32>
    %c0_8 = arith.constant 0 : index
    %c1 = arith.constant 1 : index
    %c0_9 = arith.constant 0 : index
    %c0_10 = arith.constant 0 : index
    %8 = vector.load %arg2[%c0_8, %c1, %c0_9, %c0_10] : memref<1x4x2x128xf32, #tpu.memory_space<vmem>>, vector<1x1x2x128xf32>
    %9 = vector.shape_cast %8 : vector<1x1x2x128xf32> to vector<2x128xf32>
    %10 = arith.cmpf ogt, %9, %6 : vector<2x128xf32>
    %11 = arith.select %10, %9, %6 : vector<2x128xi1>, vector<2x128xf32>
    %c1_i32 = arith.constant 1 : i32
    %12 = vector.broadcast %c1_i32 : i32 to vector<2x128xi32>
    %13 = arith.select %10, %12, %7 : vector<2x128xi1>, vector<2x128xi32>
    %c0_11 = arith.constant 0 : index
    %c2 = arith.constant 2 : index
    %c0_12 = arith.constant 0 : index
    %c0_13 = arith.constant 0 : index
    %14 = vector.load %arg2[%c0_11, %c2, %c0_12, %c0_13] : memref<1x4x2x128xf32, #tpu.memory_space<vmem>>, vector<1x1x2x128xf32>
    %15 = vector.shape_cast %14 : vector<1x1x2x128xf32> to vector<2x128xf32>
    %16 = arith.cmpf ogt, %15, %11 : vector<2x128xf32>
    %17 = arith.select %16, %15, %11 : vector<2x128xi1>, vector<2x128xf32>
    %c2_i32 = arith.constant 2 : i32
    %18 = vector.broadcast %c2_i32 : i32 to vector<2x128xi32>
    %19 = arith.select %16, %18, %13 : vector<2x128xi1>, vector<2x128xi32>
    %c0_14 = arith.constant 0 : index
    %c3 = arith.constant 3 : index
    %c0_15 = arith.constant 0 : index
    %c0_16 = arith.constant 0 : index
    %20 = vector.load %arg2[%c0_14, %c3, %c0_15, %c0_16] : memref<1x4x2x128xf32, #tpu.memory_space<vmem>>, vector<1x1x2x128xf32>
    %21 = vector.shape_cast %20 : vector<1x1x2x128xf32> to vector<2x128xf32>
    %22 = arith.cmpf ogt, %21, %17 : vector<2x128xf32>
    %c3_i32 = arith.constant 3 : i32
    %23 = vector.broadcast %c3_i32 : i32 to vector<2x128xi32>
    %24 = arith.select %22, %23, %19 : vector<2x128xi1>, vector<2x128xi32>
    %25 = arith.cmpi eq, %24, %4 : vector<2x128xi32>
    %26 = arith.extui %25 : vector<2x128xi1> to vector<2x128xi32>
    %27 = arith.sitofp %26 : vector<2x128xi32> to vector<2x128xf32>
    %c0_i32_17 = arith.constant 0 : i32
    %28 = vector.broadcast %c0_i32_17 : i32 to vector<2x128xi32>
    %29 = arith.cmpi eq, %24, %28 : vector<2x128xi32>
    %30 = arith.extui %29 : vector<2x128xi1> to vector<2x128xi32>
    %31 = arith.sitofp %30 : vector<2x128xi32> to vector<2x128xf32>
    %c0_i32_18 = arith.constant 0 : i32
    %32 = vector.broadcast %c0_i32_18 : i32 to vector<2x128xi32>
    %33 = arith.cmpi eq, %4, %32 : vector<2x128xi32>
    %34 = arith.extui %33 : vector<2x128xi1> to vector<2x128xi32>
    %35 = arith.sitofp %34 : vector<2x128xi32> to vector<2x128xf32>
    %36 = arith.addf %31, %35 : vector<2x128xf32>
    %cst = arith.constant dense<0.000000e+00> : vector<128xf32>
    %37 = vector.multi_reduction <add>, %36, %cst [0] : vector<2x128xf32> to vector<128xf32>
    %38 = vector.shape_cast %37 : vector<128xf32> to vector<1x128xf32>
    %cst_19 = arith.constant 0.000000e+00 : f32
    %39 = vector.broadcast %cst_19 : f32 to vector<2x128xf32>
    %40 = arith.select %33, %27, %39 : vector<2x128xi1>, vector<2x128xf32>
    %cst_20 = arith.constant dense<0.000000e+00> : vector<128xf32>
    %41 = vector.multi_reduction <add>, %40, %cst_20 [0] : vector<2x128xf32> to vector<128xf32>
    %42 = vector.shape_cast %41 : vector<128xf32> to vector<1x128xf32>
    %c0_21 = arith.constant 0 : index
    %c0_22 = arith.constant 0 : index
    %c0_23 = arith.constant 0 : index
    %43 = vector.load %arg4[%c0_21, %c0_22, %c0_23] : memref<1x8x128xf32, #tpu.memory_space<vmem>>, vector<1x1x128xf32>
    %44 = vector.shape_cast %43 : vector<1x1x128xf32> to vector<1x128xf32>
    %45 = arith.addf %44, %38 : vector<1x128xf32>
    %c0_24 = arith.constant 0 : index
    %c0_25 = arith.constant 0 : index
    %c0_26 = arith.constant 0 : index
    %46 = vector.load %arg4[%c0_24, %c0_25, %c0_26] : memref<1x8x128xf32, #tpu.memory_space<vmem>>, vector<1x1x128xf32>
    %47 = vector.shape_cast %46 : vector<1x1x128xf32> to vector<1x128xf32>
    %48 = vector.shape_cast %45 : vector<1x128xf32> to vector<1x1x128xf32>
    tpu.vector_store %arg4[%c0_24, %c0_25, %c0_26], %48 {strides = array<i32>} : memref<1x8x128xf32, #tpu.memory_space<vmem>>, vector<1x1x128xf32>,
    %c0_27 = arith.constant 0 : index
    %c4 = arith.constant 4 : index
    %c0_28 = arith.constant 0 : index
    %49 = vector.load %arg4[%c0_27, %c4, %c0_28] : memref<1x8x128xf32, #tpu.memory_space<vmem>>, vector<1x1x128xf32>
    %50 = vector.shape_cast %49 : vector<1x1x128xf32> to vector<1x128xf32>
    %51 = arith.addf %50, %42 : vector<1x128xf32>
    %c0_29 = arith.constant 0 : index
    %c4_30 = arith.constant 4 : index
    %c0_31 = arith.constant 0 : index
    %52 = vector.load %arg4[%c0_29, %c4_30, %c0_31] : memref<1x8x128xf32, #tpu.memory_space<vmem>>, vector<1x1x128xf32>
    %53 = vector.shape_cast %52 : vector<1x1x128xf32> to vector<1x128xf32>
    %54 = vector.shape_cast %51 : vector<1x128xf32> to vector<1x1x128xf32>
    tpu.vector_store %arg4[%c0_29, %c4_30, %c0_31], %54 {strides = array<i32>} : memref<1x8x128xf32, #tpu.memory_space<vmem>>, vector<1x1x128xf32>,
    %c1_i32_32 = arith.constant 1 : i32
    %55 = vector.broadcast %c1_i32_32 : i32 to vector<2x128xi32>
    %56 = arith.cmpi eq, %24, %55 : vector<2x128xi32>
    %57 = arith.extui %56 : vector<2x128xi1> to vector<2x128xi32>
    %58 = arith.sitofp %57 : vector<2x128xi32> to vector<2x128xf32>
    %c1_i32_33 = arith.constant 1 : i32
    %59 = vector.broadcast %c1_i32_33 : i32 to vector<2x128xi32>
    %60 = arith.cmpi eq, %4, %59 : vector<2x128xi32>
    %61 = arith.extui %60 : vector<2x128xi1> to vector<2x128xi32>
    %62 = arith.sitofp %61 : vector<2x128xi32> to vector<2x128xf32>
    %63 = arith.addf %58, %62 : vector<2x128xf32>
    %cst_34 = arith.constant dense<0.000000e+00> : vector<128xf32>
    %64 = vector.multi_reduction <add>, %63, %cst_34 [0] : vector<2x128xf32> to vector<128xf32>
    %65 = vector.shape_cast %64 : vector<128xf32> to vector<1x128xf32>
    %cst_35 = arith.constant 0.000000e+00 : f32
    %66 = vector.broadcast %cst_35 : f32 to vector<2x128xf32>
    %67 = arith.select %60, %27, %66 : vector<2x128xi1>, vector<2x128xf32>
    %cst_36 = arith.constant dense<0.000000e+00> : vector<128xf32>
    %68 = vector.multi_reduction <add>, %67, %cst_36 [0] : vector<2x128xf32> to vector<128xf32>
    %69 = vector.shape_cast %68 : vector<128xf32> to vector<1x128xf32>
    %c0_37 = arith.constant 0 : index
    %c1_38 = arith.constant 1 : index
    %c0_39 = arith.constant 0 : index
    %70 = vector.load %arg4[%c0_37, %c1_38, %c0_39] : memref<1x8x128xf32, #tpu.memory_space<vmem>>, vector<1x1x128xf32>
    %71 = vector.shape_cast %70 : vector<1x1x128xf32> to vector<1x128xf32>
    %72 = arith.addf %71, %65 : vector<1x128xf32>
    %c0_40 = arith.constant 0 : index
    %c1_41 = arith.constant 1 : index
    %c0_42 = arith.constant 0 : index
    %73 = vector.load %arg4[%c0_40, %c1_41, %c0_42] : memref<1x8x128xf32, #tpu.memory_space<vmem>>, vector<1x1x128xf32>
    %74 = vector.shape_cast %73 : vector<1x1x128xf32> to vector<1x128xf32>
    %75 = vector.shape_cast %72 : vector<1x128xf32> to vector<1x1x128xf32>
    tpu.vector_store %arg4[%c0_40, %c1_41, %c0_42], %75 {strides = array<i32>} : memref<1x8x128xf32, #tpu.memory_space<vmem>>, vector<1x1x128xf32>,
    %c0_43 = arith.constant 0 : index
    %c5 = arith.constant 5 : index
    %c0_44 = arith.constant 0 : index
    %76 = vector.load %arg4[%c0_43, %c5, %c0_44] : memref<1x8x128xf32, #tpu.memory_space<vmem>>, vector<1x1x128xf32>
    %77 = vector.shape_cast %76 : vector<1x1x128xf32> to vector<1x128xf32>
    %78 = arith.addf %77, %69 : vector<1x128xf32>
    %c0_45 = arith.constant 0 : index
    %c5_46 = arith.constant 5 : index
    %c0_47 = arith.constant 0 : index
    %79 = vector.load %arg4[%c0_45, %c5_46, %c0_47] : memref<1x8x128xf32, #tpu.memory_space<vmem>>, vector<1x1x128xf32>
    %80 = vector.shape_cast %79 : vector<1x1x128xf32> to vector<1x128xf32>
    %81 = vector.shape_cast %78 : vector<1x128xf32> to vector<1x1x128xf32>
    tpu.vector_store %arg4[%c0_45, %c5_46, %c0_47], %81 {strides = array<i32>} : memref<1x8x128xf32, #tpu.memory_space<vmem>>, vector<1x1x128xf32>,
    %c2_i32_48 = arith.constant 2 : i32
    %82 = vector.broadcast %c2_i32_48 : i32 to vector<2x128xi32>
    %83 = arith.cmpi eq, %24, %82 : vector<2x128xi32>
    %84 = arith.extui %83 : vector<2x128xi1> to vector<2x128xi32>
    %85 = arith.sitofp %84 : vector<2x128xi32> to vector<2x128xf32>
    %c2_i32_49 = arith.constant 2 : i32
    %86 = vector.broadcast %c2_i32_49 : i32 to vector<2x128xi32>
    %87 = arith.cmpi eq, %4, %86 : vector<2x128xi32>
    %88 = arith.extui %87 : vector<2x128xi1> to vector<2x128xi32>
    %89 = arith.sitofp %88 : vector<2x128xi32> to vector<2x128xf32>
    %90 = arith.addf %85, %89 : vector<2x128xf32>
    %cst_50 = arith.constant dense<0.000000e+00> : vector<128xf32>
    %91 = vector.multi_reduction <add>, %90, %cst_50 [0] : vector<2x128xf32> to vector<128xf32>
    %92 = vector.shape_cast %91 : vector<128xf32> to vector<1x128xf32>
    %cst_51 = arith.constant 0.000000e+00 : f32
    %93 = vector.broadcast %cst_51 : f32 to vector<2x128xf32>
    %94 = arith.select %87, %27, %93 : vector<2x128xi1>, vector<2x128xf32>
    %cst_52 = arith.constant dense<0.000000e+00> : vector<128xf32>
    %95 = vector.multi_reduction <add>, %94, %cst_52 [0] : vector<2x128xf32> to vector<128xf32>
    %96 = vector.shape_cast %95 : vector<128xf32> to vector<1x128xf32>
    %c0_53 = arith.constant 0 : index
    %c2_54 = arith.constant 2 : index
    %c0_55 = arith.constant 0 : index
    %97 = vector.load %arg4[%c0_53, %c2_54, %c0_55] : memref<1x8x128xf32, #tpu.memory_space<vmem>>, vector<1x1x128xf32>
    %98 = vector.shape_cast %97 : vector<1x1x128xf32> to vector<1x128xf32>
    %99 = arith.addf %98, %92 : vector<1x128xf32>
    %c0_56 = arith.constant 0 : index
    %c2_57 = arith.constant 2 : index
    %c0_58 = arith.constant 0 : index
    %100 = vector.load %arg4[%c0_56, %c2_57, %c0_58] : memref<1x8x128xf32, #tpu.memory_space<vmem>>, vector<1x1x128xf32>
    %101 = vector.shape_cast %100 : vector<1x1x128xf32> to vector<1x128xf32>
    %102 = vector.shape_cast %99 : vector<1x128xf32> to vector<1x1x128xf32>
    tpu.vector_store %arg4[%c0_56, %c2_57, %c0_58], %102 {strides = array<i32>} : memref<1x8x128xf32, #tpu.memory_space<vmem>>, vector<1x1x128xf32>,
    %c0_59 = arith.constant 0 : index
    %c6 = arith.constant 6 : index
    %c0_60 = arith.constant 0 : index
    %103 = vector.load %arg4[%c0_59, %c6, %c0_60] : memref<1x8x128xf32, #tpu.memory_space<vmem>>, vector<1x1x128xf32>
    %104 = vector.shape_cast %103 : vector<1x1x128xf32> to vector<1x128xf32>
    %105 = arith.addf %104, %96 : vector<1x128xf32>
    %c0_61 = arith.constant 0 : index
    %c6_62 = arith.constant 6 : index
    %c0_63 = arith.constant 0 : index
    %106 = vector.load %arg4[%c0_61, %c6_62, %c0_63] : memref<1x8x128xf32, #tpu.memory_space<vmem>>, vector<1x1x128xf32>
    %107 = vector.shape_cast %106 : vector<1x1x128xf32> to vector<1x128xf32>
    %108 = vector.shape_cast %105 : vector<1x128xf32> to vector<1x1x128xf32>
    tpu.vector_store %arg4[%c0_61, %c6_62, %c0_63], %108 {strides = array<i32>} : memref<1x8x128xf32, #tpu.memory_space<vmem>>, vector<1x1x128xf32>,
    %c3_i32_64 = arith.constant 3 : i32
    %109 = vector.broadcast %c3_i32_64 : i32 to vector<2x128xi32>
    %110 = arith.cmpi eq, %24, %109 : vector<2x128xi32>
    %111 = arith.extui %110 : vector<2x128xi1> to vector<2x128xi32>
    %112 = arith.sitofp %111 : vector<2x128xi32> to vector<2x128xf32>
    %c3_i32_65 = arith.constant 3 : i32
    %113 = vector.broadcast %c3_i32_65 : i32 to vector<2x128xi32>
    %114 = arith.cmpi eq, %4, %113 : vector<2x128xi32>
    %115 = arith.extui %114 : vector<2x128xi1> to vector<2x128xi32>
    %116 = arith.sitofp %115 : vector<2x128xi32> to vector<2x128xf32>
    %117 = arith.addf %112, %116 : vector<2x128xf32>
    %cst_66 = arith.constant dense<0.000000e+00> : vector<128xf32>
    %118 = vector.multi_reduction <add>, %117, %cst_66 [0] : vector<2x128xf32> to vector<128xf32>
    %119 = vector.shape_cast %118 : vector<128xf32> to vector<1x128xf32>
    %cst_67 = arith.constant 0.000000e+00 : f32
    %120 = vector.broadcast %cst_67 : f32 to vector<2x128xf32>
    %121 = arith.select %114, %27, %120 : vector<2x128xi1>, vector<2x128xf32>
    %cst_68 = arith.constant dense<0.000000e+00> : vector<128xf32>
    %122 = vector.multi_reduction <add>, %121, %cst_68 [0] : vector<2x128xf32> to vector<128xf32>
    %123 = vector.shape_cast %122 : vector<128xf32> to vector<1x128xf32>
    %c0_69 = arith.constant 0 : index
    %c3_70 = arith.constant 3 : index
    %c0_71 = arith.constant 0 : index
    %124 = vector.load %arg4[%c0_69, %c3_70, %c0_71] : memref<1x8x128xf32, #tpu.memory_space<vmem>>, vector<1x1x128xf32>
    %125 = vector.shape_cast %124 : vector<1x1x128xf32> to vector<1x128xf32>
    %126 = arith.addf %125, %119 : vector<1x128xf32>
    %c0_72 = arith.constant 0 : index
    %c3_73 = arith.constant 3 : index
    %c0_74 = arith.constant 0 : index
    %127 = vector.load %arg4[%c0_72, %c3_73, %c0_74] : memref<1x8x128xf32, #tpu.memory_space<vmem>>, vector<1x1x128xf32>
    %128 = vector.shape_cast %127 : vector<1x1x128xf32> to vector<1x128xf32>
    %129 = vector.shape_cast %126 : vector<1x128xf32> to vector<1x1x128xf32>
    tpu.vector_store %arg4[%c0_72, %c3_73, %c0_74], %129 {strides = array<i32>} : memref<1x8x128xf32, #tpu.memory_space<vmem>>, vector<1x1x128xf32>,
    %c0_75 = arith.constant 0 : index
    %c7 = arith.constant 7 : index
    %c0_76 = arith.constant 0 : index
    %130 = vector.load %arg4[%c0_75, %c7, %c0_76] : memref<1x8x128xf32, #tpu.memory_space<vmem>>, vector<1x1x128xf32>
    %131 = vector.shape_cast %130 : vector<1x1x128xf32> to vector<1x128xf32>
    %132 = arith.addf %131, %123 : vector<1x128xf32>
    %c0_77 = arith.constant 0 : index
    %c7_78 = arith.constant 7 : index
    %c0_79 = arith.constant 0 : index
    %133 = vector.load %arg4[%c0_77, %c7_78, %c0_79] : memref<1x8x128xf32, #tpu.memory_space<vmem>>, vector<1x1x128xf32>
    %134 = vector.shape_cast %133 : vector<1x1x128xf32> to vector<1x128xf32>
    %135 = vector.shape_cast %132 : vector<1x128xf32> to vector<1x1x128xf32>
    tpu.vector_store %arg4[%c0_77, %c7_78, %c0_79], %135 {strides = array<i32>} : memref<1x8x128xf32, #tpu.memory_space<vmem>>, vector<1x1x128xf32>,
    return
  }
  func.func @transform_0(%arg0: i32, %arg1: i32) -> (i32, i32, i32, i32) {
    %c0_i32 = arith.constant 0 : i32
    %c0_i32_0 = arith.constant 0 : i32
    %c0_i32_1 = arith.constant 0 : i32
    return %arg0, %c0_i32, %arg1, %c0_i32_0 : i32, i32, i32, i32
  }
  func.func @transform_1(%arg0: i32, %arg1: i32) -> (i32, i32, i32) {
    %c0_i32 = arith.constant 0 : i32
    %c0_i32_0 = arith.constant 0 : i32
    return %arg0, %arg1, %c0_i32 : i32, i32, i32
  }
  func.func @transform_2(%arg0: i32, %arg1: i32) -> (i32, i32, i32) {
    %c0_i32 = arith.constant 0 : i32
    %c0_i32_0 = arith.constant 0 : i32
    %c0_i32_1 = arith.constant 0 : i32
    return %arg0, %c0_i32, %c0_i32_0 : i32, i32, i32
  }
}

</mosaic_0001>

<bundles_post_ra>
// kernel: tpu_custom_call.1
= control target key start
LH: loop header
LB: loop body
LE: loop exit
PB: predicated region body
PF: predicated region fallthrough
CT: control target
= control target key end

     0   :  { %7 = vsyncpa [#allocation3], 0  ;;  %s1004_s0 = inlined_call_operand.hbm [shape: f32[2,4,2,128], index: 0, kind: input, shape index: {}]   ;;  %s1005_s1 = inlined_call_operand.hbm [shape: s32[2,2,128], index: 1, kind: input, shape index: {}]   ;;  %s1006_s2 = inlined_call_operand.hbm [shape: f32[2,8,128], index: 2, kind: output, shape index: {}]  }
   0x1   :  { %9 = vsyncpa [#allocation3 + $0x1], 0 }
   0x2   :  { %10 = vsyncpa [#allocation6], 0 }
   0x3   :  { %12 = vsyncpa [#allocation6 + $0x1], 0 }
   0x4   :  { %13 = vsyncpa [#allocation4], 0 }
   0x5   :  { %15 = vsyncpa [#allocation4 + $0x1], 0  ;;  %s743_s9 = smov 0   ;;  %s745_s10 = smov 0  }
   0x6   :  { %s747_s11 = smov 0   ;;  %s749_s12 = smov 0  }
   0x7   :  { %s751_s13 = smov 0   ;;  %s753_s14 = smov 0  }
   0x8 LB: > { %s472_s15 = sadd.s32 4294967295, %s719_s14   ;;  %s473_s16 = sadd.s32 4294967294, %s719_s14   ;;  %s719_s14 = sphi %s753_s14, %s21_s14   ;;  %s715_s13 = sphi %s751_s13, %s1025_s13   ;;  %s711_s12 = sphi %s749_s12, %s1024_s12   ;;  %s707_s11 = sphi %s747_s11, %s1023_s11   ;;  %s703_s10 = sphi %s745_s10, %s1022_s10   ;;  %s699_s9 = sphi %s743_s9, %s1021_s9  }
   0x9   : > { %s33_s17 = sadd.s32 1, %s715_s13  ;;  %s42_s18 = sadd.s32 1, %s707_s11 }
   0xa   : > { %p35_p0 = scmp.ge.s32.totalorder %s33_s17, 2  ;;  %p49_p1 = scmp.ne.s32.totalorder %s707_s11, %s703_s10 }
   0xb   : > { %p50_p2 = scmp.eq.s32.totalorder %s719_s14, 0  ;;  %p55_p3 = scmp.ne.s32.totalorder %s703_s10, %s699_s9 }
   0xc   : > { %s1027_s17 = smov (%p35_p0, %s33_s17), 0  ;;  %p56_p5 = scmp.eq.s32.totalorder %s472_s15, 0 }
   0xd   : > { %p784_p4 = por %p50_p2, %p49_p1  ;;  %s37_s20 = ssub.s32 %s715_s13, %s1027_s17 }
   0xe   : > { %p107_p6 = scmp.eq.s32.totalorder %s472_s15, 1  ;;  %p40_p7 = scmp.eq.s32.totalorder %s37_s20, 0 }
   0xf   : > { %p790_p8 = por %p56_p5, %p55_p3  ;;  %p113_p10 = scmp.eq.s32.totalorder %s473_s16, 1 }
  0x10   : > { %p794_p9 = por %p107_p6, %p49_p1  ;;  %p519_p13 = scmp.lt.s32.totalorder %s719_s14, 2 }
  0x11   : > { %s1010_s21 = scalar_select %p790_p8, 1, 0 }
  0x12   : > { %s1011_s22 = scalar_select %p794_p9, 1, 0 }
  0x13   : > { %s799_s23 = scalar_select %p40_p7, %s707_s11, %s42_s18  }
  0x14   : > { %p801_p11 = por %p113_p10, %p55_p3  ;;  %s808_s25 = sand.u32 1, %s707_s11  }
  0x15   : > { %s476_s26 = sshll.u32 %s808_s25, 3  ;;  %s501_s27 = sshll.u32 %s715_s13, 7 }
  0x16   : > { %s1012_s24 = scalar_select %p801_p11, 1, 0 }
  0x17   : > { %s815_s30 = scalar_lea.hbm %s1004_s0, %s501_s27  ;;  %s137_s3 = scalar_lea.vmem [#allocation2], %s476_s26 }
  0x18   : > { %s145_s4 = sshll.u32 %s137_s3, 4  ;;  %p821_p0 = pnand %p519_p13, %p784_p4  ;;  %s817_s4 = int_to_ptr.vmem [resolvable:$true] %s145_s4 }
  0x19   : > { %s134_s6 = scalar_lea.sflag [#allocation3], %s808_s25  ;;  %s573_s7 = scalar_lea.hbm %s815_s30, 128 }
  0x1a   : > { %p574_p2 = scmp.ne.s32.totalorder %s815_s30, %s573_s7  ;;  %p575_p3 = pneg %p821_p0 }
  0x1b   : > { %s578_s16 = scalar_lea.hbm %s1004_s0, 256  ;;  %p579_p4 = scmp.lt.u32.totalorder %s815_s30, %s1004_s0 }
  0x1c   : > { %p576_p5 = pnand %p575_p3, %p574_p2  ;;  %p580_p7 = scmp.lt.u32.totalorder %s578_s16, %s573_s7 }
  0x1d   : > { %p582_p13 = scmp.lt.u32.totalorder %s573_s7, %s815_s30 }
  0x1e   : > { %p577_p6 = pneg %p576_p5  ;;  %p581_p10 = por %p580_p7, %p579_p4 }
  0x20   : > { %p583_p12 = por %p582_p13, %p581_p10 }
  0x22   : > { %p584_p1 = pnand %p583_p12, %p577_p6 }
  0x24   : > { %587 = shalt.err (!%p584_p1)
}
  0x25   : > { %s588_s20 = scalar_lea.vmem %s817_s4, 128  ;;  %s721_s26 = smov [#allocation2]  }
  0x26   : > { %p589_p2 = scmp.ne.s32.totalorder %s817_s4, %s588_s20  ;;  %s593_s27 = sshll.u32 %s721_s26, 4  ;;  %s594_s27 = int_to_ptr.vmem [resolvable:$false] %s593_s27 }
  0x27   : > { %s595_s28 = scalar_lea.vmem %s594_s27, 256  ;;  %p596_p9 = scmp.lt.s32.totalorder %s817_s4, %s594_s27 }
  0x28   : > { %p591_p5 = pnand %p589_p2, %p575_p3  ;;  %p597_p4 = scmp.lt.s32.totalorder %s595_s28, %s588_s20 }
  0x2a   : > { %p592_p11 = pneg %p591_p5  ;;  %p598_p7 = por %p597_p4, %p596_p9 }
  0x2c   : > { %p599_p10 = pnand %p598_p7, %p592_p11 }
  0x2e   : > { %602 = shalt.err (!%p599_p10)
}
  0x2f   : > { %s722_s29 = smov 32   ;;  %s723_s3 = smov 2  }
  0x30   : > { %511 = dma.hbm_to_vmem [thread:$0]  (!%p821_p0), %s815_s30, 128, %s817_s4, %s134_s6, %s722_s29, %s722_s29, %s723_s3  }
  0x31   : > { %p172_p12 = scmp.lt.s32.totalorder %s719_s14, 3  ;;  %s479_s7 = sshll.u32 %s808_s25, 1 }
  0x32   : > { %s480_s8 = sshll.u32 %s715_s13, 5  ;;  %p1014_p9 = scmp.ge.s32.totalorder %s719_s14, 1 }
  0x33   : > { %s866_s19 = scalar_lea.hbm %s1005_s1, %s480_s8  ;;  %s159_s20 = scalar_lea.vmem [#allocation5], %s479_s7 }
  0x34   : > { %p859_p11 = pnand %p1014_p9, %p172_p12  ;;  %s167_s26 = sshll.u32 %s159_s20, 4  ;;  %s168_s26 = int_to_ptr.vmem [resolvable:$true] %s167_s26 }
  0x35   : > { %s156_s30 = scalar_lea.sflag [#allocation6], %s808_s25  ;;  %s603_s4 = scalar_lea.hbm %s866_s19, 32 }
  0x36   : > { %s1015_s15 = scalar_select %p859_p11, 1, 0 }
  0x37   : > { %p604_p1 = scmp.ne.s32.totalorder %s866_s19, %s603_s4  ;;  %s608_s28 = scalar_lea.hbm %s1005_s1, 64 }
  0x38   : > { %p609_p2 = scmp.lt.u32.totalorder %s866_s19, %s1005_s1  ;;  %p610_p5 = scmp.lt.u32.totalorder %s608_s28, %s603_s4 }
  0x39   : > { %p606_p6 = pnand %p604_p1, %p575_p3  ;;  %p612_p7 = scmp.lt.u32.totalorder %s603_s4, %s866_s19 }
  0x3a   : > { %p611_p4 = por %p610_p5, %p609_p2 }
  0x3b   : > { %p607_p13 = pneg %p606_p6 }
  0x3c   : > { %p613_p10 = por %p612_p7, %p611_p4 }
  0x3e   : > { %p614_p12 = pnand %p613_p10, %p607_p13 }
  0x40   : > { %617 = shalt.err (!%p614_p12)
}
  0x41   : > { %s618_s25 = scalar_lea.vmem %s168_s26, 32  ;;  %s724_s7 = smov [#allocation5]  }
  0x42   : > { %p619_p9 = scmp.ne.s32.totalorder %s168_s26, %s618_s25  ;;  %s623_s8 = sshll.u32 %s724_s7, 4  ;;  %s624_s8 = int_to_ptr.vmem [resolvable:$false] %s623_s8 }
  0x43   : > { %s625_s16 = scalar_lea.vmem %s624_s8, 64  ;;  %p626_p8 = scmp.lt.s32.totalorder %s168_s26, %s624_s8 }
  0x44   : > { %p621_p1 = pnand %p619_p9, %p575_p3  ;;  %p627_p11 = scmp.lt.s32.totalorder %s625_s16, %s618_s25 }
  0x46   : > { %p622_p6 = pneg %p621_p1  ;;  %p628_p2 = por %p627_p11, %p626_p8 }
  0x48   : > { %p629_p5 = pnand %p628_p2, %p622_p6 }
  0x4a   : > { %632 = shalt.err (!%p629_p5)
}
  0x4b   : > { %514 = dma.hbm_to_vmem [thread:$0]  (!%p821_p0), %s866_s19, 32, %s168_s26, %s156_s30  }
  0x4c   : > { %p1016_p13 = scmp.ne.s32.totalorder %s1015_s15, 0 }
  0x4d   : > { %s891_s18 = sand.u32 (!%p1016_p13), 1, %s703_s10   ;;  %p1017_p3 = scmp.ne.s32.totalorder (!%p1016_p13), %s1010_s21, 0 }
  0x4e   : > { %176 = sbr.rel (%p1016_p13) target bundleno = 140 (0x8c), region = 28  ;;  %s482_s20 = sshll.u32 (!%p1016_p13), %s891_s18, 3 }
  0x4f   : > { %s179_s4 = scalar_lea.sflag (!%p1016_p13), [#allocation3], %s891_s18  ;;  %s182_s6 = scalar_lea.vmem (!%p1016_p13), [#allocation2], %s482_s20 }
  0x55   : > { %686 = dma.done.wait (%p1017_p3), %s179_s4, 128  }
  0x56   : > { %688 = vsyncadd (%p1017_p3), %s179_s4, 4294967168  ;;  %s483_s5 = sshll.u32 %s891_s18, 1  ;;  %s188_s15 = scalar_lea.sflag [#allocation6], %s891_s18 }
  0x57   : > { %s191_s19 = scalar_lea.vmem [#allocation5], %s483_s5 }
  0x58   : > { %690 = dma.done.wait (%p1017_p3), %s188_s15, 32  }
  0x59   : > { %692 = vsyncadd (%p1017_p3), %s188_s15, 4294967264  ;;  %s905_s26 = scalar_lea.vmem [#allocation7], %s482_s20  ;;  %v725_v0 = vmov 0.0   ;;  %v222_v1 = vld [vmem:[%s191_s19] sm:$0x3]  ;;  %v726_v6 = vmov 0  }
  0x5a   : > { %221 = vst [vmem:[%s905_s26] sm:$0xff] %v725_v0  ;;  %v223_v2 = vld [vmem:[%s182_s6] sm:$0x3]  ;;  %v485_v3 = vld [vmem:[%s182_s6 + $0x2] sm:$0x3]  ;;  %v486_v4 = vld [vmem:[%s182_s6 + $0x4] sm:$0x3] }
  0x5b   : > { %vm226_vm0 = vcmp.gt.f32.partialorder %v485_v3, %v223_v2  ;;  %v487_v8 = vld [vmem:[%s182_s6 + $0x6] sm:$0x3]  ;;  %vm244_vm1 = vcmp.eq.s32.totalorder %v222_v1, 0  ;;  %vm273_vm3 = vcmp.eq.s32.totalorder %v222_v1, 1  ;;  %vm301_vm4 = vcmp.eq.s32.totalorder %v222_v1, 2  ;;  %s498_s21 = sshll.u32 %s711_s12, 7 }
  0x5c   : > { %v227_v5 = vsel %vm226_vm0, %v485_v3, %v223_v2  ;;  %v228_v7 = vsel %vm226_vm0, 1, %v726_v6  ;;  %v490_v11 = vsel %vm244_vm1, 1.0, %v725_v0  ;;  %vm248_vm6 = vcmask 1041408   ;;  %s368_s30 = sshll.u32 %s905_s26, 4  ;;  %s954_s29 = scalar_lea.hbm %s1006_s2, %s498_s21  ;;  %s956_s30 = int_to_ptr.vmem [resolvable:$true] %s368_s30 }
  0x5d   : > { %vm231_vm2 = vcmp.gt.f32.partialorder %v486_v4, %v227_v5  ;;  %vm329_vm7 = vcmp.eq.s32.totalorder %v222_v1, 3  ;;  %v492_v13 = vsel %vm273_vm3, 1.0, %v725_v0  ;;  %v494_v14 = vsel %vm301_vm4, 1.0, %v725_v0  ;;  %s355_s3 = scalar_lea.sflag [#allocation4], %s891_s18  ;;  %s633_s25 = scalar_lea.vmem %s956_s30, 128 }
  0x5e   : > { %v232_v9 = vsel %vm231_vm2, %v486_v4, %v227_v5  ;;  %v233_v10 = vsel %vm231_vm2, 2, %v228_v7  ;;  %v496_v15 = vsel %vm329_vm7, 1.0, %v725_v0  ;;  %p634_p8 = scmp.ne.s32.totalorder %s956_s30, %s633_s25  ;;  %p1018_p0 = scmp.ne.s32.totalorder %s1011_s22, 0 }
  0x5f   : > { %vm236_vm5 = vcmp.gt.f32.partialorder %v487_v8, %v232_v9  ;;  %s727_s12 = smov [#allocation7]  }
  0x60   : > { %v237_v12 = vsel %vm236_vm5, 3, %v233_v10  ;;  %p635_p11 = pnand %p634_p8, %p1018_p0  ;;  %s637_s7 = sshll.u32 %s727_s12, 4  ;;  %s638_s7 = int_to_ptr.vmem [resolvable:$false] %s637_s7 }
  0x61   : > { %vm241_vm8 = vcmp.eq.s32.totalorder %v237_v12, 0  ;;  %vm238_vm9 = vcmp.eq.s32.totalorder %v237_v12, %v222_v1  ;;  %vm270_vm10 = vcmp.eq.s32.totalorder %v237_v12, 1  ;;  %vm298_vm11 = vcmp.eq.s32.totalorder %v237_v12, 2  ;;  %v267_v60 = vld [vmem:[%s905_s26 + $0x4] sm:$0x1]  ;;  %s639_s8 = scalar_lea.vmem %s638_s7, 256  ;;  %p640_p7 = scmp.lt.s32.totalorder %s956_s30, %s638_s7 }
  0x62   : > { %v489_v16 = vsel %vm241_vm8, 1.0, %v725_v0  ;;  %v488_v17 = vsel %vm238_vm9, 1.0, %v725_v0  ;;  %v491_v18 = vsel %vm270_vm10, 1.0, %v725_v0  ;;  %v493_v19 = vsel %vm298_vm11, 1.0, %v725_v0  ;;  %v295_v2 = vld [vmem:[%s905_s26 + $0x5] sm:$0x1]  ;;  %p636_p4 = pneg %p635_p11  ;;  %p641_p10 = scmp.lt.s32.totalorder %s639_s8, %s633_s25 }
  0x63   : > { %v247_v20 = vadd.f32 %v490_v11, %v489_v16  ;;  %v256_v21 = vsel %vm244_vm1, %v488_v17, 0.0  ;;  %v276_v22 = vadd.f32 %v492_v13, %v491_v18  ;;  %v284_v23 = vsel %vm273_vm3, %v488_v17, 0.0  ;;  %v264_v5 = vld [vmem:[%s905_s26] sm:$0x1]  ;;  %v292_v7 = vld [vmem:[%s905_s26 + $0x1] sm:$0x1] }
  0x64   : > { %v257_v24 = vsel %vm248_vm6, %v256_v21, 0.0  ;;  %v285_v25 = vsel %vm248_vm6, %v284_v23, 0.0  ;;  %v304_v26 = vadd.f32 %v494_v14, %v493_v19  ;;  %v312_v27 = vsel %vm301_vm4, %v488_v17, 0.0  ;;  %v320_v13 = vld [vmem:[%s905_s26 + $0x2] sm:$0x1]  ;;  %p642_p12 = por %p641_p10, %p640_p7 }
  0x65   : > { %v249_v28 = vsel %vm248_vm6, %v247_v20, 0.0  ;;  %v258_v29 = vrot.slane %v257_v24, 4  ;;  %v277_v30 = vsel %vm248_vm6, %v276_v22, 0.0  ;;  %v286_v31 = vrot.slane %v285_v25, 4  ;;  %v323_v14 = vld [vmem:[%s905_s26 + $0x6] sm:$0x1] }
  0x66   : > { %v250_v32 = vrot.slane %v249_v28, 4  ;;  %v278_v33 = vrot.slane %v277_v30, 4  ;;  %v305_v34 = vsel %vm248_vm6, %v304_v26, 0.0  ;;  %v313_v35 = vsel %vm248_vm6, %v312_v27, 0.0  ;;  %p643_p9 = pnand %p642_p12, %p636_p4 }
  0x67   : > { %v259_v36 = vadd.f32 %v258_v29, %v257_v24  ;;  %v287_v37 = vadd.f32 %v286_v31, %v285_v25  ;;  %v306_v38 = vrot.slane %v305_v34, 4  ;;  %v314_v39 = vrot.slane %v313_v35, 4  ;;  %v351_v29 = vld [vmem:[%s905_s26 + $0x7] sm:$0x1] }
  0x68   : > { %v251_v40 = vadd.f32 %v250_v32, %v249_v28  ;;  %v279_v41 = vadd.f32 %v278_v33, %v277_v30  ;;  %vm326_vm12 = vcmp.eq.s32.totalorder %v237_v12, 3  ;;  %v340_v42 = vsel %vm329_vm7, %v488_v17, 0.0 }
  0x69   : > { %v260_v43 = vrot.slane %v259_v36, 2  ;;  %v288_v44 = vrot.slane %v287_v37, 2  ;;  %v307_v45 = vadd.f32 %v306_v38, %v305_v34  ;;  %v315_v46 = vadd.f32 %v314_v39, %v313_v35  ;;  %v348_v34 = vld [vmem:[%s905_s26 + $0x3] sm:$0x1] }
  0x6a   : > { %v252_v47 = vrot.slane %v251_v40, 2  ;;  %v280_v48 = vrot.slane %v279_v41, 2  ;;  %v495_v49 = vsel %vm326_vm12, 1.0, %v725_v0  ;;  %v341_v50 = vsel %vm248_vm6, %v340_v42, 0.0 }
  0x6b   : > { %v261_v51 = vadd.f32 %v260_v43, %v259_v36  ;;  %v289_v52 = vadd.f32 %v288_v44, %v287_v37  ;;  %v308_v53 = vrot.slane %v307_v45, 2  ;;  %v316_v54 = vrot.slane %v315_v46, 2 }
  0x6c   : > { %v253_v55 = vadd.f32 %v252_v47, %v251_v40  ;;  %v281_v56 = vadd.f32 %v280_v48, %v279_v41  ;;  %v332_v57 = vadd.f32 %v496_v15, %v495_v49  ;;  %v342_v58 = vrot.slane %v341_v50, 4 }
  0x6d   : > { %v262_v59 = vrot.slane %v261_v51, 1  ;;  %v290_v61 = vrot.slane %v289_v52, 1  ;;  %v309_v62 = vadd.f32 %v308_v53, %v307_v45  ;;  %v317_v63 = vadd.f32 %v316_v54, %v315_v46 }
  0x6e   : > { %v254_v0 = vrot.slane %v253_v55, 1  ;;  %v282_v1 = vrot.slane %v281_v56, 1  ;;  %v333_v3 = vsel %vm248_vm6, %v332_v57, 0.0  ;;  %v343_v4 = vadd.f32 %v342_v58, %v341_v50 }
  0x6f   : > { %v263_v6 = vadd.f32 %v262_v59, %v261_v51  ;;  %v291_v8 = vadd.f32 %v290_v61, %v289_v52  ;;  %v310_v9 = vrot.slane %v309_v62, 1  ;;  %v318_v10 = vrot.slane %v317_v63, 1 }
  0x70   : > { %v255_v11 = vadd.f32 %v254_v0, %v253_v55  ;;  %v283_v12 = vadd.f32 %v282_v1, %v281_v56  ;;  %v334_v15 = vrot.slane %v333_v3, 4  ;;  %v344_v16 = vrot.slane %v343_v4, 2 }
  0x71   : > { %v268_v17 = vadd.f32 %v267_v60, %v263_v6  ;;  %v296_v18 = vadd.f32 %v295_v2, %v291_v8  ;;  %v311_v19 = vadd.f32 %v310_v9, %v309_v62  ;;  %v319_v20 = vadd.f32 %v318_v10, %v317_v63 }
  0x72   : > { %v265_v21 = vadd.f32 %v264_v5, %v255_v11  ;;  %v293_v22 = vadd.f32 %v292_v7, %v283_v12  ;;  %v335_v23 = vadd.f32 %v334_v15, %v333_v3  ;;  %v345_v24 = vadd.f32 %v344_v16, %v343_v4 }
  0x73   : > { %269 = vst [vmem:[%s905_s26 + $0x4] sm:$0x1] %v268_v17  ;;  %297 = vst [vmem:[%s905_s26 + $0x5] sm:$0x1] %v296_v18  ;;  %v321_v25 = vadd.f32 %v320_v13, %v311_v19  ;;  %v324_v26 = vadd.f32 %v323_v14, %v319_v20 }
  0x74   : > { %266 = vst [vmem:[%s905_s26] sm:$0x1] %v265_v21  ;;  %294 = vst [vmem:[%s905_s26 + $0x1] sm:$0x1] %v293_v22  ;;  %v336_v27 = vrot.slane %v335_v23, 2  ;;  %v346_v28 = vrot.slane %v345_v24, 1 }
  0x75   : > { %322 = vst [vmem:[%s905_s26 + $0x2] sm:$0x1] %v321_v25  ;;  %325 = vst [vmem:[%s905_s26 + $0x6] sm:$0x1] %v324_v26 }
  0x76   : > { %v337_v30 = vadd.f32 %v336_v27, %v335_v23  ;;  %v347_v31 = vadd.f32 %v346_v28, %v345_v24 }
  0x78   : > { %v338_v32 = vrot.slane %v337_v30, 1  ;;  %v352_v33 = vadd.f32 %v351_v29, %v347_v31 }
  0x7a   : > { %v339_v35 = vadd.f32 %v338_v32, %v337_v30  ;;  %353 = vst [vmem:[%s905_s26 + $0x7] sm:$0x1] %v352_v33 }
  0x7c   : > { %v349_v36 = vadd.f32 %v348_v34, %v339_v35 }
  0x7e   : > { %350 = vst [vmem:[%s905_s26 + $0x3] sm:$0x1] %v349_v36 }
  0x7f   : > { %646 = shalt.err (!%p643_p9)
}
  0x80   : > { %s647_s16 = scalar_lea.hbm %s954_s29, 128  ;;  %s651_s4 = scalar_lea.hbm %s1006_s2, 256 }
  0x81   : > { %p648_p1 = scmp.ne.s32.totalorder %s954_s29, %s647_s16  ;;  %p652_p5 = scmp.lt.u32.totalorder %s954_s29, %s1006_s2 }
  0x82   : > { %p653_p13 = scmp.lt.u32.totalorder %s651_s4, %s647_s16  ;;  %p655_p8 = scmp.lt.u32.totalorder %s647_s16, %s954_s29 }
  0x83   : > { %p649_p6 = pnand %p648_p1, %p1018_p0 }
  0x84   : > { %p654_p3 = por %p653_p13, %p652_p5 }
  0x85   : > { %p650_p2 = pneg %p649_p6 }
  0x86   : > { %p656_p11 = por %p655_p8, %p654_p3 }
  0x88   : > { %p657_p4 = pnand %p656_p11, %p650_p2 }
  0x8a   : > { %660 = shalt.err (!%p657_p4)
}
  0x8b   : > { %506 = dma.vmem_to_hbm [thread:$0]  (%p1018_p0), %s956_s30, 128, %s954_s29, %s355_s3  }
  0x8c PF: > { %s380_s15 = sand.u32 1, %s699_s9   ;;  %p1019_p7 = scmp.ne.s32.totalorder %s1012_s24, 0 }
  0x8d   : > { %p1020_p10 = scmp.ge.s32.totalorder %s719_s14, 2  ;;  %s381_s19 = scalar_lea.sflag [#allocation4], %s380_s15 }
  0x8f   : > { %p516_p12 = pnand %p1020_p10, %p1019_p7 }
  0x91   : > { %694 = dma.done.wait (!%p516_p12), %s381_s19, 128  }
  0x92   : > { %696 = vsyncadd (!%p516_p12), %s381_s19, 4294967168  ;;  %s21_s14 = sadd.s32 1, %s719_s14   ;;  %s1021_s9 = smov %s703_s10 }
  0x93   : > { %p18_p9 = scmp.ge.s32.totalorder %s21_s14, 4   ;;  %s1022_s10 = smov %s707_s11 }
  0x94   : > { %s1023_s11 = smov %s799_s23  ;;  %s1024_s12 = smov %s715_s13 }
  0x95   : > { %s1025_s13 = smov %s1027_s17  ;;  %20 = sbr.rel (!%p18_p9) target bundleno = 8 (0x8), region = 93 }
  0x9c   :  { %386 = vsyncpa [#allocation3], 1 }
  0x9d   :  { %388 = vsyncpa [#allocation3 + $0x1], 1 }
  0x9e   :  { %389 = vsyncpa [#allocation6], 1 }
  0x9f   :  { %391 = vsyncpa [#allocation6 + $0x1], 1 }
  0xa0   :  { %392 = vsyncpa [#allocation4], 1 }
  0xa1   :  { %394 = vsyncpa [#allocation4 + $0x1], 1 }

</bundles_post_ra>
